<compile_context>
chip_gen: v5e
topology: v5e:2x2
jax: 0.10.0
libtpu: 0.0.40
codegen_flags: <defaults>
</compile_context>

<pallas_src>
import functools

import jax
import jax.numpy as jnp
from jax.experimental import pallas as pl
from jax.experimental.pallas import tpu as pltpu

VERTS_WEIGHT = 5.0


def _cdiv(a, b):
    return -(-a // b)


def _choose_tf(F):
    """Feature (lane) tile: full extent for small F, else a multiple of 128
    chosen to minimise cdiv padding waste (ties -> larger tile)."""
    if F <= 4096:
        return F                      # full-dim block is always legal
    best = None
    for cand in range(512, 4096 + 1, 128):
        waste = _cdiv(F, cand) * cand - F
        key = (waste, -cand)
        if best is None or key < best[0]:
            best = (key, cand)
    return best[1]


def _choose_tb(B, tf, grid_f, itemsize, input_budget_bytes=16 * 1024 * 1024):
    """Batch (sublane) tile: multiple of 8, capped by a VMEM budget for the
    double-buffered pred+gt blocks (2 inputs x 2 buffers)."""
    if B <= 8:
        return B                      # full-dim block
    cap = input_budget_bytes // (4 * tf * itemsize)
    cap = max(8, (cap // 8) * 8)
    tb = max(8, min(cap, 256, (B // 8) * 8))
    if grid_f == 1:
        # No feature-axis pipelining -> keep a few batch steps in flight so the
        # VPU/XLU pass overlaps the next block's inbound DMA.
        tb = min(tb, max(8, (B // 4 // 8) * 8))
    return tb


def _mesh_l1_kernel(pred_ref, gt_ref, mask_ref, out_ref, acc_ref, *,
                    B, F, tb, tf):
    # pred_ref / gt_ref : [tb, tf]     VMEM, native input dtype
    # mask_ref          : [tb, 1]      VMEM f32 (has_smpl == 1 as 0/1)
    # out_ref           : [1, 8, 128]  VMEM f32, per-batch-block partial sum
    # acc_ref           : [1, tf]      VMEM f32 scratch (column partial sums)
    i = pl.program_id(0)              # batch block  ("parallel")
    j = pl.program_id(1)              # feature block ("arbitrary" / reduction)
    nj = pl.num_programs(1)

    @pl.when(j == 0)
    def _init():
        acc_ref[...] = jnp.zeros_like(acc_ref)

    pred = pred_ref[...].astype(jnp.float32)      # in-kernel upcast (free under DMA)
    gt = gt_ref[...].astype(jnp.float32)
    diff = jnp.abs(pred - gt)

    keep = mask_ref[...] > 0.5                    # [tb, 1] bool (has_smpl == 1)
    if B % tb != 0:                               # ragged last batch block
        row = jax.lax.broadcasted_iota(jnp.int32, (tb, 1), 0)
        keep = jnp.logical_and(keep, i * tb + row < B)
    if F % tf != 0:                               # ragged last feature block
        col = jax.lax.broadcasted_iota(jnp.int32, (1, tf), 1)
        keep = jnp.logical_and(keep, j * tf + col < F)

    # where (not multiply): masked-out / padded elements can never poison the sum.
    weighted = jnp.where(keep, diff, 0.0)         # [tb, tf]
    # Sublane-only reduce per step; cross-lane reduce deferred to finalize.
    acc_ref[...] += jnp.sum(weighted, axis=0, keepdims=True)

    @pl.when(j == nj - 1)
    def _emit():
        total = jnp.sum(acc_ref[...])             # one cross-lane reduce / batch block
        out_ref[...] = jnp.full(out_ref.shape, total, dtype=jnp.float32)


def mesh_loss(pred_vertices, gt_vertices, has_smpl):
    """Returns {'vert_loss': scalar} matching the PyTorch Mesh_Loss module."""
    B, V, C = pred_vertices.shape
    F = V * C
    itemsize = jnp.dtype(pred_vertices.dtype).itemsize

    # Layout plumbing only (free reshapes, native dtype — no wrapper-side casts).
    pred2 = pred_vertices.reshape(B, F)
    gt2 = gt_vertices.reshape(B, F)
    mask2 = (has_smpl.reshape(-1) == 1).astype(jnp.float32).reshape(B, 1)

    tf = _choose_tf(F)
    grid_f = _cdiv(F, tf)
    tb = _choose_tb(B, tf, grid_f, itemsize)
    grid_b = _cdiv(B, tb)

    kernel = functools.partial(_mesh_l1_kernel, B=B, F=F, tb=tb, tf=tf)

    cost = pl.CostEstimate(
        flops=4 * B * F,
        transcendentals=0,
        bytes_accessed=2 * B * F * itemsize + 4 * B + grid_b * 8 * 128 * 4,
    )

    partials = pl.pallas_call(
        kernel,
        out_shape=jax.ShapeDtypeStruct((grid_b, 8, 128), jnp.float32),
        grid_spec=pltpu.PrefetchScalarGridSpec(
            num_scalar_prefetch=0,
            grid=(grid_b, grid_f),
            in_specs=[
                pl.BlockSpec((tb, tf), lambda i, j: (i, j)),
                pl.BlockSpec((tb, tf), lambda i, j: (i, j)),
                pl.BlockSpec((tb, 1), lambda i, j: (i, 0)),
            ],
            out_specs=pl.BlockSpec((1, 8, 128), lambda i, j: (i, 0, 0)),
            scratch_shapes=[pltpu.VMEM((1, tf), jnp.float32)],
        ),
        compiler_params=pltpu.CompilerParams(
            dimension_semantics=("parallel", "arbitrary"),
            vmem_limit_bytes=48 * 1024 * 1024,
        ),
        cost_estimate=cost,
    )(pred2, gt2, mask2)

    # Tiny O(grid_b + B) combine in plain JAX: sum partials, count valid
    # samples, normalize (L1Loss mean), empty-selection fallback, *5.0 weight.
    total = jnp.sum(partials[:, 0, 0])
    n_valid = jnp.sum(mask2)
    denom = jnp.maximum(n_valid * float(F), 1.0)
    loss = jnp.where(n_valid > 0, total / denom, 0.0) * VERTS_WEIGHT
    # TODO(synk): if batches are pre-grouped by has_smpl, prefetch n_valid_blocks
    # (PrefetchScalarGridSpec) and clamp the pred/gt index_map to skip the DMA of
    # fully-masked batch blocks.
    return {"vert_loss": loss}


def _reference(pred_vertices, gt_vertices, has_smpl):
    """Pure-JAX reference reproducing the PyTorch semantics (for checking)."""
    m = (has_smpl.reshape(-1) == 1).astype(jnp.float32)
    n_valid = jnp.sum(m)
    d = jnp.abs(pred_vertices.astype(jnp.float32) - gt_vertices.astype(jnp.float32))
    total = jnp.sum(d * m[:, None, None])
    denom = jnp.maximum(
        n_valid * pred_vertices.shape[1] * pred_vertices.shape[2], 1.0)
    return jnp.where(n_valid > 0, total / denom, 0.0) * VERTS_WEIGHT


if __name__ == "__main__":
    key = jax.random.PRNGKey(0)
    k1, k2, k3, k4 = jax.random.split(key, 4)

    # Case 1: small f32 batch, single full-extent feature block (F = 1293).
    B, V, C = 4, 431, 3
    pred = jax.random.normal(k1, (B, V, C), dtype=jnp.float32)
    gt = jax.random.normal(k2, (B, V, C), dtype=jnp.float32)
    has_smpl = jnp.array([1.0, 0.0, 1.0, 0.0], dtype=jnp.float32)

    got = jax.block_until_ready(mesh_loss(pred, gt, has_smpl)["vert_loss"])
    ref = jax.block_until_ready(_reference(pred, gt, has_smpl))
    assert abs(float(got) - float(ref)) <= 1e-4 * max(1.0, abs(float(ref))), (
        float(got), float(ref))

    # Empty selection fallback: no sample has SMPL -> loss must be exactly 0.
    got0 = jax.block_until_ready(
        mesh_loss(pred, gt, jnp.zeros((B,), jnp.float32))["vert_loss"])
    assert float(got0) == 0.0, float(got0)

    # Case 2: bf16 inputs, tiled non-multiple-of-128 feature axis (F = 5169)
    # and ragged batch (B = 12, tb = 8) -> exercises edge-block masking,
    # in-kernel upcast and the per-batch-block partial outputs.
    B2, V2, C2 = 12, 1723, 3
    pred_b = jax.random.normal(k3, (B2, V2, C2), dtype=jnp.float32).astype(jnp.bfloat16)
    gt_b = jax.random.normal(k4, (B2, V2, C2), dtype=jnp.float32).astype(jnp.bfloat16)
    has_b = (jnp.arange(B2) % 3 == 0).astype(jnp.float32)

    got2 = jax.block_until_ready(mesh_loss(pred_b, gt_b, has_b)["vert_loss"])
    ref2 = jax.block_until_ready(_reference(pred_b, gt_b, has_b))
    assert abs(float(got2) - float(ref2)) <= 2e-3 * max(1.0, abs(float(ref2))), (
        float(got2), float(ref2))

    print("KERNEL_OK")
</pallas_src>

<mosaic_0001>
module attributes {stable_mosaic.version = 11 : i64} {
  func.func @_mesh_l1_kernel(%arg0: i32, %arg1: i32, %arg2: memref<4x1293xf32, #tpu.memory_space<vmem>>, %arg3: memref<4x1293xf32, #tpu.memory_space<vmem>>, %arg4: memref<4x1xf32, #tpu.memory_space<vmem>>, %arg5: memref<1x8x128xf32, #tpu.memory_space<vmem>>, %arg6: memref<1x1293xf32, #tpu.memory_space<vmem>>) attributes {dimension_semantics = [#tpu.dimension_semantics<parallel>, #tpu.dimension_semantics<arbitrary>], iteration_bounds = array<i64: 1, 1>, scalar_prefetch = 0 : i64, scratch_operands = 1 : i64, tpu.core_type = #tpu.core_type<tc>, window_params = [{transform_indices = @transform_0, window_bounds = array<i64: 4, 1293>}, {transform_indices = @transform_1, window_bounds = array<i64: 4, 1293>}, {transform_indices = @transform_2, window_bounds = array<i64: 4, 1>}, {transform_indices = @transform_3, window_bounds = array<i64: 1, 8, 128>}]} {
    %c0_i32 = arith.constant 0 : i32
    %0 = arith.cmpi eq, %arg1, %c0_i32 : i32
    %1 = arith.extui %0 : i1 to i32
    %c0_i32_0 = arith.constant 0 : i32
    %2 = arith.cmpi ne, %1, %c0_i32_0 : i32
    scf.if %2 {
      %cst_14 = arith.constant 0.000000e+00 : f32
      %22 = vector.broadcast %cst_14 : f32 to vector<1x1293xf32>
      %c0_15 = arith.constant 0 : index
      %c0_16 = arith.constant 0 : index
      %23 = vector.load %arg6[%c0_15, %c0_16] : memref<1x1293xf32, #tpu.memory_space<vmem>>, vector<1x1293xf32>
      tpu.vector_store %arg6[%c0_15, %c0_16], %22 {strides = array<i32>} : memref<1x1293xf32, #tpu.memory_space<vmem>>, vector<1x1293xf32>,
    } else {
    }
    %c0 = arith.constant 0 : index
    %c0_1 = arith.constant 0 : index
    %3 = vector.load %arg2[%c0, %c0_1] : memref<4x1293xf32, #tpu.memory_space<vmem>>, vector<4x1293xf32>
    %c0_2 = arith.constant 0 : index
    %c0_3 = arith.constant 0 : index
    %4 = vector.load %arg3[%c0_2, %c0_3] : memref<4x1293xf32, #tpu.memory_space<vmem>>, vector<4x1293xf32>
    %5 = arith.subf %3, %4 : vector<4x1293xf32>
    %6 = math.absf %5 : vector<4x1293xf32>
    %c0_4 = arith.constant 0 : index
    %c0_5 = arith.constant 0 : index
    %7 = vector.load %arg4[%c0_4, %c0_5] : memref<4x1xf32, #tpu.memory_space<vmem>>, vector<4x1xf32>
    %cst = arith.constant 5.000000e-01 : f32
    %8 = vector.broadcast %cst : f32 to vector<4x1xf32>
    %9 = arith.cmpf ogt, %7, %8 : vector<4x1xf32>
    %cst_6 = arith.constant 0.000000e+00 : f32
    %10 = vector.shape_cast %9 : vector<4x1xi1> to vector<4x1xi1>
    %11 = vector.broadcast %10 : vector<4x1xi1> to vector<4x1293xi1>
    %12 = vector.broadcast %cst_6 : f32 to vector<4x1293xf32>
    %13 = arith.select %11, %6, %12 : vector<4x1293xi1>, vector<4x1293xf32>
    %c0_7 = arith.constant 0 : index
    %c0_8 = arith.constant 0 : index
    %14 = vector.load %arg6[%c0_7, %c0_8] : memref<1x1293xf32, #tpu.memory_space<vmem>>, vector<1x1293xf32>
    %cst_9 = arith.constant dense<0.000000e+00> : vector<1293xf32>
    %15 = vector.multi_reduction <add>, %13, %cst_9 [0] : vector<4x1293xf32> to vector<1293xf32>
    %16 = vector.shape_cast %15 : vector<1293xf32> to vector<1x1293xf32>
    %17 = arith.addf %14, %16 : vector<1x1293xf32>
    %c0_10 = arith.constant 0 : index
    %c0_11 = arith.constant 0 : index
    %18 = vector.load %arg6[%c0_10, %c0_11] : memref<1x1293xf32, #tpu.memory_space<vmem>>, vector<1x1293xf32>
    tpu.vector_store %arg6[%c0_10, %c0_11], %17 {strides = array<i32>} : memref<1x1293xf32, #tpu.memory_space<vmem>>, vector<1x1293xf32>,
    %c0_i32_12 = arith.constant 0 : i32
    %19 = arith.cmpi eq, %arg1, %c0_i32_12 : i32
    %20 = arith.extui %19 : i1 to i32
    %c0_i32_13 = arith.constant 0 : i32
    %21 = arith.cmpi ne, %20, %c0_i32_13 : i32
    scf.if %21 {
      %c0_14 = arith.constant 0 : index
      %c0_15 = arith.constant 0 : index
      %22 = vector.load %arg6[%c0_14, %c0_15] : memref<1x1293xf32, #tpu.memory_space<vmem>>, vector<1x1293xf32>
      %23 = vector.shape_cast %22 : vector<1x1293xf32> to vector<1x1x1293xf32>
      %cst_16 = arith.constant dense<0.000000e+00> : vector<1xf32>
      %24 = vector.multi_reduction <add>, %23, %cst_16 [1, 2] : vector<1x1x1293xf32> to vector<1xf32>
      %25 = vector.shape_cast %24 : vector<1xf32> to vector<1x1x1xf32>
      %26 = vector.extract %25[0, 0, 0] : f32 from vector<1x1x1xf32>
      %27 = vector.broadcast %26 : f32 to vector<1x8x128xf32>
      %c0_17 = arith.constant 0 : index
      %c0_18 = arith.constant 0 : index
      %c0_19 = arith.constant 0 : index
      %28 = vector.load %arg5[%c0_17, %c0_18, %c0_19] : memref<1x8x128xf32, #tpu.memory_space<vmem>>, vector<1x8x128xf32>
      tpu.vector_store %arg5[%c0_17, %c0_18, %c0_19], %27 {strides = array<i32>} : memref<1x8x128xf32, #tpu.memory_space<vmem>>, vector<1x8x128xf32>,
    } else {
    }
    return
  }
  func.func @transform_0(%arg0: i32, %arg1: i32) -> (i32, i32) {
    %c0_i32 = arith.constant 0 : i32
    return %arg0, %arg1 : i32, i32
  }
  func.func @transform_1(%arg0: i32, %arg1: i32) -> (i32, i32) {
    %c0_i32 = arith.constant 0 : i32
    return %arg0, %arg1 : i32, i32
  }
  func.func @transform_2(%arg0: i32, %arg1: i32) -> (i32, i32) {
    %c0_i32 = arith.constant 0 : i32
    %c0_i32_0 = arith.constant 0 : i32
    return %arg0, %c0_i32 : i32, i32
  }
  func.func @transform_3(%arg0: i32, %arg1: i32) -> (i32, i32, i32) {
    %c0_i32 = arith.constant 0 : i32
    %c0_i32_0 = arith.constant 0 : i32
    %c0_i32_1 = arith.constant 0 : i32
    return %arg0, %c0_i32, %c0_i32_0 : i32, i32, i32
  }
}

</mosaic_0001>

<bundles_post_ra>
// kernel: tpu_custom_call.1
= control target key start
LH: loop header
LB: loop body
LE: loop exit
PB: predicated region body
PF: predicated region fallthrough
CT: control target
= control target key end

     0   :  { %8 = vsyncpa [#allocation4], 0  ;;  %s505_s0 = inlined_call_operand.hbm [shape: f32[4,1293], index: 0, kind: input, shape index: {}]   ;;  %s506_s1 = inlined_call_operand.hbm [shape: f32[4,1293], index: 1, kind: input, shape index: {}]   ;;  %s507_s2 = inlined_call_operand.vmem [shape: f32[4,1], index: 2, kind: input, shape index: {}]   ;;  %s508_s3 = inlined_call_operand.hbm [shape: f32[1,8,128], index: 3, kind: output, shape index: {}]  }
   0x1   :  { %9 = vsyncpa [#allocation7], 0 }
   0x2   :  { %10 = vsyncpa [#allocation5], 0  ;;  %s16_s14 = sshll.u32 %s505_s0, 4  ;;  %s424_s15 = smov [#allocation3]   ;;  %s17_s14 = int_to_ptr.hbm [resolvable:$true] %s16_s14 }
   0x3   :  { %s18_s16 = sshll.u32 %s424_s15, 4  ;;  %s27_s19 = sshll.u32 %s506_s1, 4  ;;  %s19_s16 = int_to_ptr.vmem [resolvable:$true] %s18_s16  ;;  %s28_s19 = int_to_ptr.hbm [resolvable:$true] %s27_s19 }
   0x4   :  { %21 = dma.hbm_to_vmem [thread:$0]  %s17_s14, 704, %s19_s16, [#allocation4]  }
   0x5   :  { %s425_s20 = smov [#allocation6]  }
   0x6   :  { %s29_s21 = sshll.u32 %s425_s20, 4  ;;  %s30_s21 = int_to_ptr.vmem [resolvable:$true] %s29_s21 }
   0x7   :  { %32 = dma.hbm_to_vmem [thread:$0]  %s28_s19, 704, %s30_s21, [#allocation7]  }
   0x8   :  { %418 = dma.done.wait [#allocation4], 704  }
   0x9   :  { %419 = vsyncadd [#allocation4], 4294966592 }
   0xa   :  { %420 = dma.done.wait [#allocation7], 704  }
   0xb   :  { %421 = vsyncadd [#allocation7], 4294966592  ;;  %v426_v0 = vmov 0   ;;  %v77_v1 = vld [vmem:[%s507_s2] sm:$0xf]  ;;  %v53_v3 = vld [vmem:[#allocation3] sm:$0xff]  ;;  %v48_v31 = vlaneseq }
   0xc   :  { %345 = vset.pattern.permute.xlu0 %v426_v0  ;;  %vm78_vm0 = vcmp.gt.f32.partialorder %v77_v1, 0.5  ;;  %v54_v4 = vld [vmem:[#allocation3 + $0x8] sm:$0xff]  ;;  %v60_v6 = vld [vmem:[#allocation6 + $0x8] sm:$0xff]  ;;  %v57_v13 = vld [vmem:[#allocation3 + $0x20] sm:$0xff]  ;;  %v427_v33 = vmov 0.0   ;;  %vm134_vm2 = vcmask 1043456  }
   0xd   :  { %v79_v2 = vsel %vm78_vm0, 1, %v426_v0  ;;  %v59_v5 = vld [vmem:[#allocation6] sm:$0xff]  ;;  %v66_v8 = vsub.f32 %v54_v4, %v60_v6  ;;  %v56_v12 = vld [vmem:[#allocation3 + $0x18] sm:$0xff]  ;;  %v58_v14 = vld [vmem:[#allocation3 + $0x28] sm:$0xf]  ;;  %vm458_vm1 = vcmp.lt.s32.totalorder %v48_v31, 269 }
   0xe   :  { %81 = vperm.xlu0 %345, %v79_v2   ;;  %v65_v7 = vsub.f32 %v53_v3, %v59_v5  ;;  %v55_v11 = vld [vmem:[#allocation3 + $0x10] sm:$0xff]  ;;  %v61_v15 = vld [vmem:[#allocation6 + $0x10] sm:$0xff]  ;;  %v62_v16 = vld [vmem:[#allocation6 + $0x18] sm:$0xff]  ;;  %52 = vst.msk [vmem:[#allocation2 + $0x8] sm:$0x7] %vm458_vm1, %v427_v33  ;;  %vm205_vm4 = vcmask 101376  }
   0xf   :  { %v72_v10 = vand.u32 2147483647, %v66_v8  ;;  %v63_v17 = vld [vmem:[#allocation6 + $0x20] sm:$0xff]  ;;  %v64_v18 = vld [vmem:[#allocation6 + $0x28] sm:$0xf]  ;;  %v67_v19 = vsub.f32 %v55_v11, %v61_v15  ;;  %v68_v20 = vsub.f32 %v56_v12, %v62_v16  ;;  %vm235_vm5 = vcmask 1042434  }
  0x10   :  { %v71_v9 = vand.u32 2147483647, %v65_v7  ;;  %v69_v21 = vsub.f32 %v57_v13, %v63_v17  ;;  %v70_v22 = vsub.f32 %v58_v14, %v64_v18  ;;  %vm233_vm6 = vcmask 1040384   ;;  %s327_s23 = sshll.u32 %s508_s3, 4  ;;  %s428_s24 = smov [#allocation8]   ;;  %s328_s23 = int_to_ptr.hbm [resolvable:$true] %s327_s23 }
  0x11   :  { %92 = vst [vmem:[#allocation1 + $0x10] ss:$2 sm:$0xff] %v72_v10  ;;  %v73_v23 = vand.u32 2147483647, %v67_v19  ;;  %v74_v24 = vand.u32 2147483647, %v68_v20 }
  0x12   :  { %90 = vst [vmem:[#allocation1] ss:$2 sm:$0xff] %v71_v9  ;;  %v75_v25 = vand.u32 2147483647, %v69_v21  ;;  %v76_v26 = vand.u32 2147483647, %v70_v22 }
  0x13   :  { %94 = vst [vmem:[#allocation1 + $0x20] ss:$2 sm:$0xff] %v73_v23  ;;  %vm239_vm7 = vcmask 1044484   ;;  %vm237_vm8 = vcmask 1041408   ;;  %vm241_vm9 = vcmask 1046534   ;;  %vm243_vm10 = vcmask 1045508  }
  0x14   :  { %96 = vst [vmem:[#allocation1 + $0x30] ss:$2 sm:$0xff] %v74_v24  ;;  %vm306_vm11 = vcmask 98304   ;;  %s325_s25 = sshll.u32 %s428_s24, 4  ;;  %s326_s25 = int_to_ptr.vmem [resolvable:$true] %s325_s25 }
  0x18   :  { %v99_v29 = vld.sshfl [vmem:[#allocation1 + $0x10] sm:$0xff pattern:$0x75316420]  ;;  %v100_v30 = vld.sshfl [vmem:[#allocation1 + $0x18] sm:$0xff pattern:$0x75316420] }
  0x19   :  { %v97_v27 = vld.sshfl [vmem:[#allocation1] sm:$0xff pattern:$0x75316420]  ;;  %v98_v28 = vld.sshfl [vmem:[#allocation1 + $0x8] sm:$0xff pattern:$0x75316420] }
  0x1a   :  { %105 = vst [vmem:[#allocation1] ss:$2 sm:$0xff] %v75_v25  ;;  %v101_v34 = vld.sshfl [vmem:[#allocation1 + $0x20] sm:$0xff pattern:$0x75316420] }
  0x1b   :  { %106 = vst [vmem:[#allocation1 + $0x10] ss:$2 sm:$0xff] %v76_v26  ;;  %v102_v35 = vld.sshfl [vmem:[#allocation1 + $0x28] sm:$0xff pattern:$0x75316420] }
  0x1c   :  { %v103_v36 = vld.sshfl [vmem:[#allocation1 + $0x30] sm:$0xff pattern:$0x75316420]  ;;  %v104_v37 = vld.sshfl [vmem:[#allocation1 + $0x38] sm:$0xff pattern:$0x75316420] }
  0x21   :  { %v107_v39 = vld.sshfl [vmem:[#allocation1] sm:$0xff pattern:$0x75316420]  ;;  %v108_v40 = vld.sshfl [vmem:[#allocation1 + $0x8] sm:$0xff pattern:$0x75316420] }
  0x22   :  { %v109_v41 = vld.sshfl [vmem:[#allocation1 + $0x10] sm:$0xff pattern:$0x75316420] }
  0x80   :  { %v82_v38 = vpop.permute.xlu0 %81 }
  0x81   :  { %vm83_vm3 = vcmp.eq.s32.totalorder %v82_v38, 1 }
  0x82   :  { %v121_v42 = vsel %vm83_vm3, %v97_v27, 0.0  ;;  %v122_v43 = vsel %vm83_vm3, %v98_v28, 0.0  ;;  %v123_v44 = vsel %vm83_vm3, %v99_v29, 0.0  ;;  %v124_v45 = vsel %vm83_vm3, %v100_v30, 0.0 }
  0x83   :  { %v125_v46 = vsel %vm83_vm3, %v101_v34, 0.0  ;;  %v126_v47 = vsel %vm83_vm3, %v102_v35, 0.0  ;;  %v127_v48 = vsel %vm83_vm3, %v103_v36, 0.0  ;;  %v128_v49 = vsel %vm83_vm3, %v104_v37, 0.0 }
  0x84   :  { %v129_v50 = vsel %vm83_vm3, %v107_v39, 0.0  ;;  %v464_v51 = vsel %vm83_vm3, %v108_v40, 0.0  ;;  %v466_v52 = vsel %vm83_vm3, %v109_v41, 0.0  ;;  %v135_v53 = vsel %vm134_vm2, %v121_v42, 0.0 }
  0x85   :  { %v136_v54 = vrot.slane %v135_v53, 4  ;;  %v142_v55 = vsel %vm134_vm2, %v122_v43, 0.0  ;;  %v149_v56 = vsel %vm134_vm2, %v123_v44, 0.0  ;;  %v156_v57 = vsel %vm134_vm2, %v124_v45, 0.0 }
  0x86   :  { %v143_v58 = vrot.slane %v142_v55, 4  ;;  %v150_v59 = vrot.slane %v149_v56, 4  ;;  %v157_v60 = vrot.slane %v156_v57, 4  ;;  %v163_v61 = vsel %vm134_vm2, %v125_v46, 0.0 }
  0x87   :  { %v137_v62 = vadd.f32 %v136_v54, %v135_v53  ;;  %v164_v63 = vrot.slane %v163_v61, 4  ;;  %v170_v0 = vsel %vm134_vm2, %v126_v47, 0.0  ;;  %v177_v1 = vsel %vm134_vm2, %v127_v48, 0.0 }
  0x88   :  { %v144_v2 = vadd.f32 %v143_v58, %v142_v55  ;;  %v151_v3 = vadd.f32 %v150_v59, %v149_v56  ;;  %v158_v4 = vadd.f32 %v157_v60, %v156_v57  ;;  %v171_v5 = vrot.slane %v170_v0, 4 }
  0x89   :  { %v138_v6 = vrot.slane %v137_v62, 2  ;;  %v165_v7 = vadd.f32 %v164_v63, %v163_v61  ;;  %v178_v8 = vrot.slane %v177_v1, 4  ;;  %v184_v9 = vsel %vm134_vm2, %v128_v49, 0.0 }
  0x8a   :  { %v145_v10 = vrot.slane %v144_v2, 2  ;;  %v152_v11 = vrot.slane %v151_v3, 2  ;;  %v159_v12 = vrot.slane %v158_v4, 2  ;;  %v172_v13 = vadd.f32 %v171_v5, %v170_v0 }
  0x8b   :  { %v139_v14 = vadd.f32 %v138_v6, %v137_v62  ;;  %v166_v15 = vrot.slane %v165_v7, 2  ;;  %v179_v16 = vadd.f32 %v178_v8, %v177_v1  ;;  %v185_v17 = vrot.slane %v184_v9, 4 }
  0x8c   :  { %v146_v18 = vadd.f32 %v145_v10, %v144_v2  ;;  %v153_v19 = vadd.f32 %v152_v11, %v151_v3  ;;  %v160_v20 = vadd.f32 %v159_v12, %v158_v4  ;;  %v173_v21 = vrot.slane %v172_v13, 2 }
  0x8d   :  { %v140_v22 = vrot.slane %v139_v14, 1  ;;  %v167_v23 = vadd.f32 %v166_v15, %v165_v7  ;;  %v180_v24 = vrot.slane %v179_v16, 2  ;;  %v186_v25 = vadd.f32 %v185_v17, %v184_v9 }
  0x8e   :  { %v147_v26 = vrot.slane %v146_v18, 1  ;;  %v154_v27 = vrot.slane %v153_v19, 1  ;;  %v161_v28 = vrot.slane %v160_v20, 1  ;;  %v174_v29 = vadd.f32 %v173_v21, %v172_v13 }
  0x8f   :  { %v141_v30 = vadd.f32 %v140_v22, %v139_v14  ;;  %v168_v31 = vrot.slane %v167_v23, 1  ;;  %v181_v33 = vadd.f32 %v180_v24, %v179_v16  ;;  %v187_v34 = vrot.slane %v186_v25, 2  ;;  %v133_v22 = vld [vmem:[#allocation2 + $0x8] sm:$0x7] }
  0x90   :  { %v148_v35 = vadd.f32 %v147_v26, %v146_v18  ;;  %v155_v36 = vadd.f32 %v154_v27, %v153_v19  ;;  %v162_v37 = vadd.f32 %v161_v28, %v160_v20  ;;  %v175_v38 = vrot.slane %v174_v29, 1 }
  0x91   :  { %v169_v39 = vadd.f32 %v168_v31, %v167_v23  ;;  %v182_v40 = vrot.slane %v181_v33, 1  ;;  %v188_v41 = vadd.f32 %v187_v34, %v186_v25  ;;  %v191_v42 = vsel %vm134_vm2, %v129_v50, 0.0 }
  0x92   :  { %v176_v43 = vadd.f32 %v175_v38, %v174_v29  ;;  %v192_v44 = vrot.slane %v191_v42, 4  ;;  %v198_v45 = vsel %vm134_vm2, %v464_v51, 0.0  ;;  %v206_v46 = vsel %vm205_vm4, %v466_v52, 0.0 }
  0x93   :  { %v183_v47 = vadd.f32 %v182_v40, %v181_v33  ;;  %v189_v48 = vrot.slane %v188_v41, 1  ;;  %v199_v49 = vrot.slane %v198_v45, 4  ;;  %v207_v53 = vrot.slane %v206_v46, 4 }
  0x94   :  { %v193_v54 = vadd.f32 %v192_v44, %v191_v42  ;;  %v224_v55 = vrot.slane %v148_v35, 7  ;;  %v225_v56 = vrot.slane %v155_v36, 6  ;;  %v226_v57 = vrot.slane %v162_v37, 5 }
  0x95   :  { %v190_v58 = vadd.f32 %v189_v48, %v188_v41  ;;  %v200_v59 = vadd.f32 %v199_v49, %v198_v45  ;;  %v208_v60 = vadd.f32 %v207_v53, %v206_v46  ;;  %v227_v50 = vrot.slane %v169_v39, 4 }
  0x96   :  { %v194_v61 = vrot.slane %v193_v54, 2  ;;  %v228_v62 = vrot.slane %v176_v43, 3  ;;  %v229_v63 = vrot.slane %v183_v47, 2  ;;  %v236_v51 = vsel %vm235_vm5, %v225_v56, %v226_v57 }
  0x97   :  { %v201_v0 = vrot.slane %v200_v59, 2  ;;  %v209_v1 = vrot.slane %v208_v60, 2  ;;  %v230_v52 = vrot.slane %v190_v58, 1  ;;  %v234_v2 = vsel %vm233_vm6, %v141_v30, %v224_v55 }
  0x98   :  { %v195_v3 = vadd.f32 %v194_v61, %v193_v54  ;;  %v240_v4 = vsel %vm239_vm7, %v227_v50, %v228_v62  ;;  %v238_v5 = vsel %vm237_vm8, %v234_v2, %v236_v51 }
  0x99   :  { %v202_v6 = vadd.f32 %v201_v0, %v200_v59  ;;  %v210_v7 = vadd.f32 %v209_v1, %v208_v60  ;;  %v242_v8 = vsel %vm241_vm9, %v229_v63, %v230_v52 }
  0x9a   :  { %v244_v9 = vsel %vm243_vm10, %v240_v4, %v242_v8  ;;  %v196_v10 = vrot.slane %v195_v3, 1 }
  0x9b   :  { %v203_v11 = vrot.slane %v202_v6, 1  ;;  %v211_v12 = vrot.slane %v210_v7, 1  ;;  %v245_v13 = vsel %vm134_vm2, %v238_v5, %v244_v9 }
  0x9c   :  { %v265_v16 = vperm.slane %v245_v13, 0  ;;  %v266_v17 = vperm.slane %v245_v13, 1  ;;  %v267_v18 = vperm.slane %v245_v13, 2  ;;  %v197_v19 = vadd.f32 %v196_v10, %v195_v3 }
  0x9d   :  { %v204_v14 = vadd.f32 %v203_v11, %v202_v6  ;;  %v212_v15 = vadd.f32 %v211_v12, %v210_v7  ;;  %v268_v23 = vperm.slane %v245_v13, 3  ;;  %v269_v29 = vperm.slane %v245_v13, 4 }
  0x9e   :  { %v287_v24 = vsel %vm233_vm6, %v265_v16, 0.0  ;;  %v288_v25 = vsel %vm233_vm6, %v266_v17, 0.0  ;;  %v290_v30 = vsel %vm233_vm6, %v267_v18, 0.0  ;;  %v270_v34 = vperm.slane %v245_v13, 5 }
  0x9f   :  { %v231_v20 = vrot.slane %v204_v14, 7  ;;  %v232_v21 = vrot.slane %v212_v15, 6  ;;  %v289_v27 = vadd.f32 %v288_v25, %v287_v24  ;;  %v292_v35 = vsel %vm233_vm6, %v268_v23, 0.0 }
  0xa0   :  { %v271_v37 = vperm.slane %v245_v13, 6  ;;  %v294_v38 = vsel %vm233_vm6, %v269_v29, 0.0  ;;  %v272_v40 = vperm.slane %v245_v13, 7  ;;  %v296_v41 = vsel %vm233_vm6, %v270_v34, 0.0 }
  0xa1   :  { %v246_v26 = vsel %vm233_vm6, %v197_v19, %v231_v20  ;;  %v291_v33 = vadd.f32 %v290_v30, %v289_v27 }
  0xa2   :  { %v247_v28 = vsel %vm237_vm8, %v246_v26, %v232_v21  ;;  %v298_v43 = vsel %vm233_vm6, %v271_v37, 0.0  ;;  %v300_v46 = vsel %vm233_vm6, %v272_v40, 0.0 }
  0xa3   :  { %v251_v31 = vadd.f32 %v247_v28, %v133_v22  ;;  %v293_v36 = vadd.f32 %v292_v35, %v291_v33 }
  0xa5   :  { %257 = vst.msk [vmem:[#allocation2 + $0x8] sm:$0x7] %vm458_vm1, %v251_v31  ;;  %v295_v39 = vadd.f32 %v294_v38, %v293_v36 }
  0xa7   :  { %v297_v42 = vadd.f32 %v296_v41, %v295_v39 }
  0xa9   :  { %v299_v44 = vadd.f32 %v298_v43, %v297_v42 }
  0xab   :  { %v301_v49 = vadd.f32 %v300_v46, %v299_v44 }
  0xac   :  { %v262_v45 = vld [vmem:[#allocation2 + $0x8] sm:$0x7] }
  0xad   :  { %v273_v47 = vperm.slane %v262_v45, 0  ;;  %v274_v48 = vperm.slane %v262_v45, 1  ;;  %v275_v32 = vperm.slane %v262_v45, 2 }
  0xaf   :  { %v302_v53 = vsel %vm233_vm6, %v273_v47, 0.0  ;;  %v304_v55 = vsel %vm233_vm6, %v274_v48, 0.0  ;;  %v307_v57 = vsel %vm306_vm11, %v275_v32, 0.0 }
  0xb0   :  { %v303_v54 = vadd.f32 %v302_v53, %v301_v49 }
  0xb2   :  { %v305_v56 = vadd.f32 %v304_v55, %v303_v54 }
  0xb4   :  { %v308_v58 = vadd.f32 %v307_v57, %v305_v56 }
  0xb6   :  { %309 = vadd.xlane.f32.xlu0 %v308_v58 }
 0x129   :  { %v310_v59 = vpop.xlane.xlu0 %309 }
 0x12a   :  { %v311_v60 = vrot.slane %v310_v59, 4 }
 0x12c   :  { %v312_v50 = vadd.f32 %v311_v60, %v310_v59 }
 0x12e   :  { %v313_v61 = vrot.slane %v312_v50, 2 }
 0x130   :  { %v314_v62 = vadd.f32 %v313_v61, %v312_v50 }
 0x132   :  { %v315_v63 = vrot.slane %v314_v62, 1 }
 0x134   :  { %v316_v51 = vadd.f32 %v315_v63, %v314_v62 }
 0x136   :  { %338 = vpush %v316_v51 }
 0x167   :  { %s339_s26 = spop %338 }
 0x168   :  { %v318_v0 = vstv %s339_s26 }
 0x169   :  { %319 = vst [vmem:[#allocation8] sm:$0xff] %v318_v0 }
 0x16a   :  { %330 = dma.vmem_to_hbm [thread:$0]  %s326_s25, 128, %s328_s23, [#allocation5]  }
 0x16b   :  { %422 = dma.done.wait [#allocation5], 128  }
 0x16c   :  { %423 = vsyncadd [#allocation5], 4294967168 }
 0x16d   :  { %335 = vsyncpa [#allocation4], 1 }
 0x16e   :  { %336 = vsyncpa [#allocation7], 1 }
 0x16f   :  { %337 = vsyncpa [#allocation5], 1 }

</bundles_post_ra>
